<compile_context>
chip_gen: v7x
topology: tpu7x:2x2x1
jax: 0.10.0
libtpu: 0.0.40
codegen_flags: <defaults>
</compile_context>

<pallas_src>
import functools

import jax
import jax.numpy as jnp
from jax.experimental import pallas as pl
from jax.experimental.pallas import tpu as pltpu

EPS = 1e-5


def _elu_feature_map(x):
    # EluFeatureMap: pi(x) = elu(x) + 1  (strictly positive)
    return jnp.where(x > 0, x + 1.0, jnp.exp(x))


def _chunked_linear_attn_kernel(q_ref, k_ref, v_ref, o_ref, s_state, z_state,
                                *, mxu_dtype):
    """One (batch, head, seq-chunk) grid step.

    q_ref/k_ref: (Tc, E); v_ref/o_ref: (Tc, Ev); s_state: (E, Ev); z_state: (1, E).
    """
    c = pl.program_id(2)
    tc = q_ref.shape[0]

    # Reset the carried state at the start of every (b, h) sequence.
    @pl.when(c == 0)
    def _():
        s_state[...] = jnp.zeros_like(s_state)
        z_state[...] = jnp.zeros_like(z_state)

    # Feature map + normalization math in f32; MXU operands in `mxu_dtype`.
    q = _elu_feature_map(q_ref[...].astype(jnp.float32))
    k = _elu_feature_map(k_ref[...].astype(jnp.float32))

    # The reference loop starts at idx = 1: drop global key row 0 by zeroing
    # phi(k) there (O(Tc*E) work instead of an extra O(Tc^2) mask term).
    grow = jax.lax.broadcasted_iota(jnp.int32, (tc, 1), 0) + c * tc
    k = jnp.where(grow >= 1, k, 0.0)

    q_m = q.astype(mxu_dtype)
    k_m = k.astype(mxu_dtype)
    v_m = v_ref[...].astype(mxu_dtype)

    # Intra-chunk scores with the K-transpose fused into the MXU operand.
    scores = jax.lax.dot_general(
        q_m, k_m, (((1,), (1,)), ((), ())), preferred_element_type=jnp.float32)
    i_idx = jax.lax.broadcasted_iota(jnp.int32, (tc, tc), 0)
    j_idx = jax.lax.broadcasted_iota(jnp.int32, (tc, tc), 1)
    masked = jnp.where(i_idx >= j_idx, scores, 0.0).astype(mxu_dtype)

    # Numerator: intra-chunk contribution + all previous chunks (carried state).
    numer = (
        jnp.dot(masked, v_m, preferred_element_type=jnp.float32)
        + jnp.dot(q_m, s_state[...].astype(mxu_dtype),
                  preferred_element_type=jnp.float32))

    # Denominator on the MXU (no O(Tc^2) cross-lane reduce on the XLU).
    ones_col = jnp.ones((tc, 1), dtype=mxu_dtype)
    denom = (
        jnp.dot(masked, ones_col, preferred_element_type=jnp.float32)
        + jax.lax.dot_general(q_m, z_state[...].astype(mxu_dtype),
                              (((1,), (1,)), ((), ())),
                              preferred_element_type=jnp.float32)
        + EPS)

    # Divide on the EUP (separate VLIW slot) instead of the VALU.
    o_ref[...] = (numer * pl.reciprocal(denom, approx=True)).astype(o_ref.dtype)

    # Fold the full current chunk into the running state (f32 accumulation).
    s_state[...] += jax.lax.dot_general(
        k_m, v_m, (((0,), (0,)), ((), ())), preferred_element_type=jnp.float32)
    z_state[...] += jnp.sum(k, axis=0, keepdims=True)


def _pick_chunk(seq_len):
    for tc in (256, 128, 64, 32, 16, 8):
        if seq_len % tc == 0:
            return tc
    return seq_len  # small / odd seq_len: single full-extent block is legal


def loop_sdp_attention(q, k, v, *, chunk=None, mxu_dtype=jnp.bfloat16):
    """q, k: (B, H, S, E), v: (B, H, S, Ev) -> (B, H, S, Ev) float32."""
    B, H, S, E = q.shape
    Ev = v.shape[-1]
    if chunk is None:
        chunk = _pick_chunk(S)
    assert S % chunk == 0, f"chunk {chunk} must divide seq_len {S}"
    n_chunks = S // chunk

    kernel = functools.partial(_chunked_linear_attn_kernel, mxu_dtype=mxu_dtype)

    # VMEM budget from the tile math (double-buffered blocks + state + headroom
    # for the (Tc, Tc) intra-chunk intermediates), clamped so it is safe on both
    # v5e/v6e (128 MiB) and v7x (64 MiB physical).
    in_bytes = q.dtype.itemsize
    block_bytes = 2 * (2 * chunk * E * in_bytes           # q, k (double-buffered)
                       + chunk * Ev * v.dtype.itemsize    # v
                       + chunk * Ev * 4)                  # out (f32)
    scratch_bytes = (E * Ev + E) * 4
    temp_bytes = 8 * chunk * chunk * 4 + 8 * chunk * max(E, Ev) * 4
    vmem_limit = min(32 * 1024 * 1024,
                     max(8 * 1024 * 1024,
                         4 * (block_bytes + scratch_bytes + temp_bytes)))

    grid_spec = pltpu.PrefetchScalarGridSpec(
        num_scalar_prefetch=0,
        grid=(B, H, n_chunks),
        in_specs=[
            pl.BlockSpec((None, None, chunk, E), lambda b, h, c: (b, h, c, 0)),
            pl.BlockSpec((None, None, chunk, E), lambda b, h, c: (b, h, c, 0)),
            pl.BlockSpec((None, None, chunk, Ev), lambda b, h, c: (b, h, c, 0)),
        ],
        out_specs=pl.BlockSpec((None, None, chunk, Ev),
                               lambda b, h, c: (b, h, c, 0)),
        scratch_shapes=[
            pltpu.VMEM((E, Ev), jnp.float32),   # running s = sum phi(k) v^T
            pltpu.VMEM((1, E), jnp.float32),    # running z = sum phi(k)
        ],
    )

    # NOTE: for tiny head dims (Ev < 128) a further store-path win is available by
    # batching heads per grid step with a lane-dense (B, S, H*Ev) output layout;
    # not done here to keep the (B, H, S, Ev) contract of the reference module.
    return pl.pallas_call(
        kernel,
        out_shape=jax.ShapeDtypeStruct((B, H, S, Ev), jnp.float32),
        grid_spec=grid_spec,
        compiler_params=pltpu.CompilerParams(
            # B/H axes shard across TensorCores (v7x megacore); the sequence-chunk
            # axis carries the recurrence state so it stays "arbitrary" and last.
            dimension_semantics=("parallel", "parallel", "arbitrary"),
            vmem_limit_bytes=int(vmem_limit)),
    )(q, k, v)


def reference_loop(q, k, v, eps=EPS):
    """Pure-JAX emulation of the (intended) PyTorch per-step loop, in f32."""
    qf = _elu_feature_map(q.astype(jnp.float32))
    kf = _elu_feature_map(k.astype(jnp.float32))
    vf = v.astype(jnp.float32)
    B, H, S, E = qf.shape
    Ev = vf.shape[-1]

    z = jnp.zeros((B, H, E), jnp.float32)
    s = jnp.zeros((B, H, E, Ev), jnp.float32)
    outs = [jnp.zeros((B, H, Ev), jnp.float32)]  # step 0 is never computed
    for idx in range(1, S):
        k_i = kf[:, :, idx, :]
        v_i = vf[:, :, idx, :]
        z = z + k_i
        s = s + jnp.einsum('bhk,bhv->bhkv', k_i, v_i)
        q_i = qf[:, :, idx, :]
        deno = jnp.einsum('nhe,nhe->nh', q_i, z) + eps
        no = jnp.einsum('nhe,nhev->nhv', q_i, s)
        outs.append(no / deno[..., None])
    return jnp.stack(outs, axis=2)


if __name__ == "__main__":
    key = jax.random.PRNGKey(0)
    k1, k2, k3, k4, k5, k6 = jax.random.split(key, 6)

    # --- Test 1: module-sized shapes, single chunk, f32 MXU path -------------
    B, H, S, E, Ev = 2, 4, 8, 16, 16
    q = jax.random.normal(k1, (B, H, S, E), jnp.float32)
    k = jax.random.normal(k2, (B, H, S, E), jnp.float32)
    v = jax.random.normal(k3, (B, H, S, Ev), jnp.float32)

    out = jax.block_until_ready(loop_sdp_attention(q, k, v, mxu_dtype=jnp.float32))
    ref = jax.block_until_ready(reference_loop(q, k, v))
    assert out.shape == (B, H, S, Ev)
    err = float(jnp.max(jnp.abs(out - ref)))
    # Exact f32 math except the EUP approximate reciprocal (~1e-3-level).
    assert err < 2e-2, f"f32 path max abs err = {err}"

    # --- Test 2: multi-chunk recurrence + bf16 MXU operands (v6e/v7x path) ---
    B2, H2, S2 = 2, 2, 32
    q2 = jax.random.normal(k4, (B2, H2, S2, E), jnp.float32)
    k2_ = jax.random.normal(k5, (B2, H2, S2, E), jnp.float32)
    v2 = jax.random.normal(k6, (B2, H2, S2, Ev), jnp.float32)

    out2 = jax.block_until_ready(
        loop_sdp_attention(q2, k2_, v2, chunk=8, mxu_dtype=jnp.bfloat16))
    ref2 = jax.block_until_ready(reference_loop(q2, k2_, v2))
    assert out2.shape == (B2, H2, S2, Ev)
    err2 = float(jnp.max(jnp.abs(out2 - ref2)))
    # bf16 MXU operands + approx reciprocal: ~1e-2-level absolute error expected.
    assert err2 < 6e-2, f"bf16 path max abs err = {err2}"

    print("KERNEL_OK")
</pallas_src>

<mosaic_0001>
module attributes {stable_mosaic.version = 11 : i64} {
  func.func @_chunked_linear_attn_kernel(%arg0: i32, %arg1: i32, %arg2: i32, %arg3: memref<1x1x8x16xf32, #tpu.memory_space<vmem>>, %arg4: memref<1x1x8x16xf32, #tpu.memory_space<vmem>>, %arg5: memref<1x1x8x16xf32, #tpu.memory_space<vmem>>, %arg6: memref<1x1x8x16xf32, #tpu.memory_space<vmem>>, %arg7: memref<16x16xf32, #tpu.memory_space<vmem>>, %arg8: memref<1x16xf32, #tpu.memory_space<vmem>>) attributes {dimension_semantics = [#tpu.dimension_semantics<parallel>, #tpu.dimension_semantics<parallel>, #tpu.dimension_semantics<arbitrary>], iteration_bounds = array<i64: 2, 4, 1>, scalar_prefetch = 0 : i64, scratch_operands = 2 : i64, tpu.core_type = #tpu.core_type<tc>, window_params = [{transform_indices = @transform_0, window_bounds = array<i64: 1, 1, 8, 16>}, {transform_indices = @transform_1, window_bounds = array<i64: 1, 1, 8, 16>}, {transform_indices = @transform_2, window_bounds = array<i64: 1, 1, 8, 16>}, {transform_indices = @transform_3, window_bounds = array<i64: 1, 1, 8, 16>}]} {
    %c0_i32 = arith.constant 0 : i32
    %0 = arith.cmpi eq, %arg2, %c0_i32 : i32
    %1 = arith.extui %0 : i1 to i32
    %c0_i32_0 = arith.constant 0 : i32
    %2 = arith.cmpi ne, %1, %c0_i32_0 : i32
    scf.if %2 {
      %cst_42 = arith.constant 0.000000e+00 : f32
      %63 = vector.broadcast %cst_42 : f32 to vector<16x16xf32>
      %c0_43 = arith.constant 0 : index
      %c0_44 = arith.constant 0 : index
      %64 = vector.load %arg7[%c0_43, %c0_44] : memref<16x16xf32, #tpu.memory_space<vmem>>, vector<16x16xf32>
      tpu.vector_store %arg7[%c0_43, %c0_44], %63 {strides = array<i32>} : memref<16x16xf32, #tpu.memory_space<vmem>>, vector<16x16xf32>,
      %cst_45 = arith.constant 0.000000e+00 : f32
      %65 = vector.broadcast %cst_45 : f32 to vector<1x16xf32>
      %c0_46 = arith.constant 0 : index
      %c0_47 = arith.constant 0 : index
      %66 = vector.load %arg8[%c0_46, %c0_47] : memref<1x16xf32, #tpu.memory_space<vmem>>, vector<1x16xf32>
      tpu.vector_store %arg8[%c0_46, %c0_47], %65 {strides = array<i32>} : memref<1x16xf32, #tpu.memory_space<vmem>>, vector<1x16xf32>,
    } else {
    }
    %c0 = arith.constant 0 : index
    %c0_1 = arith.constant 0 : index
    %c0_2 = arith.constant 0 : index
    %c0_3 = arith.constant 0 : index
    %3 = vector.load %arg3[%c0, %c0_1, %c0_2, %c0_3] : memref<1x1x8x16xf32, #tpu.memory_space<vmem>>, vector<1x1x8x16xf32>
    %4 = vector.shape_cast %3 : vector<1x1x8x16xf32> to vector<8x16xf32>
    %cst = arith.constant 0.000000e+00 : f32
    %5 = vector.broadcast %cst : f32 to vector<8x16xf32>
    %6 = arith.cmpf ogt, %4, %5 : vector<8x16xf32>
    %cst_4 = arith.constant 1.000000e+00 : f32
    %7 = vector.broadcast %cst_4 : f32 to vector<8x16xf32>
    %8 = arith.addf %4, %7 : vector<8x16xf32>
    %9 = math.exp %4 : vector<8x16xf32>
    %10 = arith.select %6, %8, %9 : vector<8x16xi1>, vector<8x16xf32>
    %c0_5 = arith.constant 0 : index
    %c0_6 = arith.constant 0 : index
    %c0_7 = arith.constant 0 : index
    %c0_8 = arith.constant 0 : index
    %11 = vector.load %arg4[%c0_5, %c0_6, %c0_7, %c0_8] : memref<1x1x8x16xf32, #tpu.memory_space<vmem>>, vector<1x1x8x16xf32>
    %12 = vector.shape_cast %11 : vector<1x1x8x16xf32> to vector<8x16xf32>
    %cst_9 = arith.constant 0.000000e+00 : f32
    %13 = vector.broadcast %cst_9 : f32 to vector<8x16xf32>
    %14 = arith.cmpf ogt, %12, %13 : vector<8x16xf32>
    %cst_10 = arith.constant 1.000000e+00 : f32
    %15 = vector.broadcast %cst_10 : f32 to vector<8x16xf32>
    %16 = arith.addf %12, %15 : vector<8x16xf32>
    %17 = math.exp %12 : vector<8x16xf32>
    %18 = arith.select %14, %16, %17 : vector<8x16xi1>, vector<8x16xf32>
    %19 = tpu.iota {dimensions = array<i32: 0>} : vector<8x1xi32>
    %c8_i32 = arith.constant 8 : i32
    %20 = arith.muli %arg2, %c8_i32 : i32
    %21 = vector.broadcast %20 : i32 to vector<8x1xi32>
    %22 = arith.addi %19, %21 : vector<8x1xi32>
    %c1_i32 = arith.constant 1 : i32
    %23 = vector.broadcast %c1_i32 : i32 to vector<8x1xi32>
    %24 = arith.cmpi sge, %22, %23 : vector<8x1xi32>
    %cst_11 = arith.constant 0.000000e+00 : f32
    %25 = vector.shape_cast %24 : vector<8x1xi1> to vector<8x1xi1>
    %26 = vector.broadcast %25 : vector<8x1xi1> to vector<8x16xi1>
    %27 = vector.broadcast %cst_11 : f32 to vector<8x16xf32>
    %28 = arith.select %26, %18, %27 : vector<8x16xi1>, vector<8x16xf32>
    %c0_12 = arith.constant 0 : index
    %c0_13 = arith.constant 0 : index
    %c0_14 = arith.constant 0 : index
    %c0_15 = arith.constant 0 : index
    %29 = vector.load %arg5[%c0_12, %c0_13, %c0_14, %c0_15] : memref<1x1x8x16xf32, #tpu.memory_space<vmem>>, vector<1x1x8x16xf32>
    %30 = vector.shape_cast %29 : vector<1x1x8x16xf32> to vector<8x16xf32>
    %cst_16 = arith.constant dense<0.000000e+00> : vector<8x8xf32>
    %31 = tpu.matmul %10, %28, %cst_16 {dimension_numbers = #tpu.dot_dimension_numbers<[1], [1], [0], [0], [0, 0, 1, 0], [], []>} : vector<8x16xf32>, vector<8x16xf32>, vector<8x8xf32> -> vector<8x8xf32>
    %32 = tpu.iota {dimensions = array<i32: 0>} : vector<8x8xi32>
    %33 = tpu.iota {dimensions = array<i32: 1>} : vector<8x8xi32>
    %34 = arith.cmpi sge, %32, %33 : vector<8x8xi32>
    %cst_17 = arith.constant 0.000000e+00 : f32
    %35 = vector.broadcast %cst_17 : f32 to vector<8x8xf32>
    %36 = arith.select %34, %31, %35 : vector<8x8xi1>, vector<8x8xf32>
    %cst_18 = arith.constant dense<0.000000e+00> : vector<8x16xf32>
    %37 = tpu.matmul %36, %30, %cst_18 {dimension_numbers = #tpu.dot_dimension_numbers<[1], [0], [0], [1], [0, 0, 1, 1], [], []>} : vector<8x8xf32>, vector<8x16xf32>, vector<8x16xf32> -> vector<8x16xf32>
    %c0_19 = arith.constant 0 : index
    %c0_20 = arith.constant 0 : index
    %38 = vector.load %arg7[%c0_19, %c0_20] : memref<16x16xf32, #tpu.memory_space<vmem>>, vector<16x16xf32>
    %cst_21 = arith.constant dense<0.000000e+00> : vector<8x16xf32>
    %39 = tpu.matmul %10, %38, %cst_21 {dimension_numbers = #tpu.dot_dimension_numbers<[1], [0], [0], [1], [0, 0, 1, 1], [], []>} : vector<8x16xf32>, vector<16x16xf32>, vector<8x16xf32> -> vector<8x16xf32>
    %40 = arith.addf %37, %39 : vector<8x16xf32>
    %cst_22 = arith.constant 1.000000e+00 : f32
    %41 = vector.broadcast %cst_22 : f32 to vector<8x1xf32>
    %cst_23 = arith.constant dense<0.000000e+00> : vector<8x1xf32>
    %42 = tpu.matmul %36, %41, %cst_23 {dimension_numbers = #tpu.dot_dimension_numbers<[1], [0], [0], [1], [0, 0, 1, 1], [], []>} : vector<8x8xf32>, vector<8x1xf32>, vector<8x1xf32> -> vector<8x1xf32>
    %c0_24 = arith.constant 0 : index
    %c0_25 = arith.constant 0 : index
    %43 = vector.load %arg8[%c0_24, %c0_25] : memref<1x16xf32, #tpu.memory_space<vmem>>, vector<1x16xf32>
    %cst_26 = arith.constant dense<0.000000e+00> : vector<8x1xf32>
    %44 = tpu.matmul %10, %43, %cst_26 {dimension_numbers = #tpu.dot_dimension_numbers<[1], [1], [0], [0], [0, 0, 1, 0], [], []>} : vector<8x16xf32>, vector<1x16xf32>, vector<8x1xf32> -> vector<8x1xf32>
    %45 = arith.addf %42, %44 : vector<8x1xf32>
    %cst_27 = arith.constant 9.99999974E-6 : f32
    %46 = vector.broadcast %cst_27 : f32 to vector<8x1xf32>
    %47 = arith.addf %45, %46 : vector<8x1xf32>
    %48 = tpu.reciprocal %47 {approx = true} : vector<8x1xf32> -> vector<8x1xf32>
    %49 = vector.broadcast %48 : vector<8x1xf32> to vector<8x16xf32>
    %50 = arith.mulf %40, %49 : vector<8x16xf32>
    %c0_28 = arith.constant 0 : index
    %c0_29 = arith.constant 0 : index
    %c0_30 = arith.constant 0 : index
    %c0_31 = arith.constant 0 : index
    %51 = vector.load %arg6[%c0_28, %c0_29, %c0_30, %c0_31] : memref<1x1x8x16xf32, #tpu.memory_space<vmem>>, vector<1x1x8x16xf32>
    %52 = vector.shape_cast %51 : vector<1x1x8x16xf32> to vector<8x16xf32>
    %53 = vector.shape_cast %50 : vector<8x16xf32> to vector<1x1x8x16xf32>
    tpu.vector_store %arg6[%c0_28, %c0_29, %c0_30, %c0_31], %53 {strides = array<i32>} : memref<1x1x8x16xf32, #tpu.memory_space<vmem>>, vector<1x1x8x16xf32>,
    %c0_32 = arith.constant 0 : index
    %c0_33 = arith.constant 0 : index
    %54 = vector.load %arg7[%c0_32, %c0_33] : memref<16x16xf32, #tpu.memory_space<vmem>>, vector<16x16xf32>
    %cst_34 = arith.constant dense<0.000000e+00> : vector<16x16xf32>
    %55 = tpu.matmul %28, %30, %cst_34 {dimension_numbers = #tpu.dot_dimension_numbers<[0], [0], [1], [1], [0, 1, 1, 1], [], []>} : vector<8x16xf32>, vector<8x16xf32>, vector<16x16xf32> -> vector<16x16xf32>
    %56 = arith.addf %54, %55 : vector<16x16xf32>
    %c0_35 = arith.constant 0 : index
    %c0_36 = arith.constant 0 : index
    %57 = vector.load %arg7[%c0_35, %c0_36] : memref<16x16xf32, #tpu.memory_space<vmem>>, vector<16x16xf32>
    tpu.vector_store %arg7[%c0_35, %c0_36], %56 {strides = array<i32>} : memref<16x16xf32, #tpu.memory_space<vmem>>, vector<16x16xf32>,
    %c0_37 = arith.constant 0 : index
    %c0_38 = arith.constant 0 : index
    %58 = vector.load %arg8[%c0_37, %c0_38] : memref<1x16xf32, #tpu.memory_space<vmem>>, vector<1x16xf32>
    %cst_39 = arith.constant dense<0.000000e+00> : vector<16xf32>
    %59 = vector.multi_reduction <add>, %28, %cst_39 [0] : vector<8x16xf32> to vector<16xf32>
    %60 = vector.shape_cast %59 : vector<16xf32> to vector<1x16xf32>
    %61 = arith.addf %58, %60 : vector<1x16xf32>
    %c0_40 = arith.constant 0 : index
    %c0_41 = arith.constant 0 : index
    %62 = vector.load %arg8[%c0_40, %c0_41] : memref<1x16xf32, #tpu.memory_space<vmem>>, vector<1x16xf32>
    tpu.vector_store %arg8[%c0_40, %c0_41], %61 {strides = array<i32>} : memref<1x16xf32, #tpu.memory_space<vmem>>, vector<1x16xf32>,
    return
  }
  func.func @transform_0(%arg0: i32, %arg1: i32, %arg2: i32) -> (i32, i32, i32, i32) {
    %c0_i32 = arith.constant 0 : i32
    %c0_i32_0 = arith.constant 0 : i32
    return %arg0, %arg1, %arg2, %c0_i32 : i32, i32, i32, i32
  }
  func.func @transform_1(%arg0: i32, %arg1: i32, %arg2: i32) -> (i32, i32, i32, i32) {
    %c0_i32 = arith.constant 0 : i32
    %c0_i32_0 = arith.constant 0 : i32
    return %arg0, %arg1, %arg2, %c0_i32 : i32, i32, i32, i32
  }
  func.func @transform_2(%arg0: i32, %arg1: i32, %arg2: i32) -> (i32, i32, i32, i32) {
    %c0_i32 = arith.constant 0 : i32
    %c0_i32_0 = arith.constant 0 : i32
    return %arg0, %arg1, %arg2, %c0_i32 : i32, i32, i32, i32
  }
  func.func @transform_3(%arg0: i32, %arg1: i32, %arg2: i32) -> (i32, i32, i32, i32) {
    %c0_i32 = arith.constant 0 : i32
    %c0_i32_0 = arith.constant 0 : i32
    return %arg0, %arg1, %arg2, %c0_i32 : i32, i32, i32, i32
  }
}

</mosaic_0001>

<bundles_post_ra>
// kernel: tpu_custom_call.1
= control target key start
LH: loop header
LB: loop body
LE: loop exit
PB: predicated region body
PF: predicated region fallthrough
CT: control target
= control target key end

     0   :  { %s1644_s0 = inlined_call_operand.hbm [shape: f32[2,4,8,16], index: 0, kind: input, shape index: {}]   ;;  %s1645_s1 = inlined_call_operand.hbm [shape: f32[2,4,8,16], index: 1, kind: input, shape index: {}]   ;;  %s1646_s2 = inlined_call_operand.hbm [shape: f32[2,4,8,16], index: 2, kind: input, shape index: {}]   ;;  %s1647_s3 = inlined_call_operand.hbm [shape: f32[2,4,8,16], index: 3, kind: output, shape index: {}]  }
   0x1   :  { %1657 = sst [smem:[#allocation20_spill]] %s1645_s1 }
   0x2   :  { %8 = vsyncpa [#allocation5], 0 }
   0x3   :  { %10 = vsyncpa [#allocation5 + $0x1], 0 }
   0x4   :  { %11 = vsyncpa [#allocation8], 0 }
   0x5   :  { %13 = vsyncpa [#allocation8 + $0x1], 0 }
   0x6   :  { %14 = vsyncpa [#allocation6], 0 }
   0x7   :  { %16 = vsyncpa [#allocation6 + $0x1], 0  ;;  %s1334_s12 = smov 0   ;;  %s1336_s13 = smov 0  }
   0x8   :  { %s1338_s14 = smov 0   ;;  %s1340_s15 = smov 0  }
   0x9   :  { %s1342_s16 = smov 0   ;;  %s1344_s17 = smov 0  }
   0xa   :  { %s1346_s18 = smov 0   ;;  %s1348_s19 = smov 0  }
   0xb LB: > { %1658 = sst [smem:[#allocation14_spill]] %s1295_s17  ;;  %s1375_s20 = sadd.s32 4294967295, %s1303_s19   ;;  %s1303_s19 = sphi %s1348_s19, %s22_s19   ;;  %s1299_s18 = sphi %s1346_s18, %s1685_s18   ;;  %s1295_s17 = sphi %s1344_s17, %s1684_s17   ;;  %s1291_s16 = sphi %s1342_s16, %s1683_s16   ;;  %s1287_s15 = sphi %s1340_s15, %s1682_s15   ;;  %s1283_s14 = sphi %s1338_s14, %s1688_s14   ;;  %s1279_s13 = sphi %s1336_s13, %s1687_s13   ;;  %s1275_s12 = sphi %s1334_s12, %s1686_s12  }
   0xc   : > { %1659 = sst [smem:[#allocation15_spill]] %s1299_s18  ;;  %s936_s21 = sadd.s32 4294967294, %s1303_s19  }
   0xd   : > { %s37_s22 = sadd.s32 1, %s1295_s17  ;;  %s41_s23 = sadd.s32 1, %s1299_s18 }
   0xe   : > { %p39_p0 = scmp.ge.s32.totalorder %s37_s22, 4  ;;  %s52_s24 = sadd.s32 1, %s1283_s14 }
   0xf   : > { %p59_p1 = scmp.ne.s32.totalorder %s1283_s14, %s1279_s13  ;;  %p60_p2 = scmp.eq.s32.totalorder %s1303_s19, 0 }
  0x10   : > { %s1690_s22 = smov (%p39_p0, %s37_s22), 0  ;;  %s1692_s23 = smov (!%p39_p0, %s41_s23), %s1299_s18 }
  0x11   : > { %1660 = sst [smem:[#allocation16_spill]] %s1690_s22  ;;  %s46_s25 = ssub.s32 %s1295_s17, %s1690_s22 }
  0x12   : > { %p1389_p3 = por %p60_p2, %p59_p1  ;;  %p43_p4 = scmp.ge.s32.totalorder %s1692_s23, 2 }
  0x13   : > { %p65_p5 = scmp.ne.s32.totalorder %s1279_s13, %s1275_s12  ;;  %p66_p6 = scmp.eq.s32.totalorder %s1375_s20, 0 }
  0x14   : > { %p153_p7 = scmp.eq.s32.totalorder %s1375_s20, 7  ;;  %s1694_s23 = smov (%p43_p4, %s1692_s23), 0 }
  0x15   : > { %1662 = sst [smem:[#allocation17_spill]] %s1694_s23  ;;  %p1399_p8 = por %p66_p6, %p65_p5 }
  0x16   : > { %p1403_p9 = por %p153_p7, %p59_p1  ;;  %s45_s29 = ssub.s32 %s1299_s18, %s1694_s23 }
  0x17   : > { %s1663_s27 = scalar_select %p1399_p8, 1, 0 }
  0x18   : > { %s1664_s28 = scalar_select %p1403_p9, 1, 0 }
  0x19   : > { %p159_p10 = scmp.eq.s32.totalorder %s936_s21, 7  ;;  %s47_s30 = sor.u32 %s46_s25, %s45_s29 }
  0x1a   : > { %p50_p11 = scmp.eq.s32.totalorder %s47_s30, 0  ;;  %p1032_p13 = scmp.lt.s32.totalorder %s1303_s19, 8 }
  0x1b   : > { %p1409_p12 = por %p159_p10, %p65_p5  ;;  %s1648_s5 = sand.u32 1, %s1283_s14  }
  0x1c   : > { %s1416_s6 = scalar_select %p50_p11, %s1283_s14, %s52_s24  }
  0x1d   : > { %s1665_s4 = scalar_select %p1409_p12, 1, 0 }
  0x1e   : > { %1667 = sst [smem:[#allocation19_spill]] %s1416_s6  ;;  %s1420_s7 = sshll.u32 %s1648_s5, 3 }
  0x1f   : > { %1666 = sst [smem:[#allocation18_spill]] %s1665_s4  ;;  %s940_s8 = sshll.u32 %s1299_s18, 2 }
  0x20   : > { %s189_s9 = sadd.s32 %s1295_s17, %s940_s8  ;;  %p1426_p0 = pnand %p1032_p13, %p1389_p3 }
  0x21   : > { %s1430_s11 = sshll.u32 %s189_s9, 7  ;;  %s200_s21 = sand.u32 1, %s1303_s19  }
  0x22   : > { %s1668_s10 = scalar_select %p1426_p0, 1, 0 }
  0x23   : > { %s1669_s1 = sld [smem:[#allocation20_spill]]  ;;  %s204_s30 = scalar_lea.vmem [#allocation7], %s1420_s7 }
  0x24   : > { %s214_s26 = sshll.u32 %s204_s30, 4  ;;  %s1444_s8 = scalar_lea.sflag [#allocation8], %s200_s21  ;;  %s1441_s26 = int_to_ptr.vmem [resolvable:$true] %s214_s26 }
  0x25   : > { %p1450_p4 = pneg %p1426_p0 }
  0x29   : > { %s1437_s24 = scalar_lea.hbm %s1669_s1, %s1430_s11  ;;  %s1116_s30 = scalar_lea.hbm %s1669_s1, 1024 }
  0x2a   : > { %s1111_s9 = scalar_lea.hbm %s1437_s24, 128  ;;  %p1117_p7 = scmp.lt.u32.totalorder %s1437_s24, %s1669_s1 }
  0x2b   : > { %p1112_p3 = scmp.ne.s32.totalorder %s1437_s24, %s1111_s9  ;;  %p1118_p10 = scmp.lt.u32.totalorder %s1116_s30, %s1111_s9 }
  0x2c   : > { %p1120_p13 = scmp.lt.u32.totalorder %s1111_s9, %s1437_s24 }
  0x2d   : > { %p1114_p5 = pnand %p1450_p4, %p1112_p3  ;;  %p1119_p11 = por %p1118_p10, %p1117_p7 }
  0x2f   : > { %p1115_p6 = pneg %p1114_p5  ;;  %p1121_p1 = por %p1120_p13, %p1119_p11 }
  0x31   : > { %p1122_p2 = pnand %p1121_p1, %p1115_p6 }
  0x33   : > { %1125 = shalt.err (!%p1122_p2)
}
  0x34   : > { %s1126_s21 = scalar_lea.vmem %s1441_s26, 128  ;;  %s1305_s25 = smov [#allocation7]  }
  0x35   : > { %p1127_p3 = scmp.ne.s32.totalorder %s1441_s26, %s1126_s21  ;;  %s1131_s29 = sshll.u32 %s1305_s25, 4  ;;  %s1132_s29 = int_to_ptr.vmem [resolvable:$false] %s1131_s29 }
  0x36   : > { %s1133_s22 = scalar_lea.vmem %s1132_s29, 256  ;;  %p1134_p9 = scmp.lt.s32.totalorder %s1441_s26, %s1132_s29 }
  0x37   : > { %p1129_p5 = pnand %p1127_p3, %p1450_p4  ;;  %p1135_p8 = scmp.lt.s32.totalorder %s1133_s22, %s1126_s21 }
  0x39   : > { %p1130_p12 = pneg %p1129_p5  ;;  %p1136_p7 = por %p1135_p8, %p1134_p9 }
  0x3b   : > { %p1137_p10 = pnand %p1136_p7, %p1130_p12 }
  0x3d   : > { %1140 = shalt.err (!%p1137_p10)
}
  0x3e   : > { %1024 = dma.hbm_to_vmem [thread:$0]  (!%p1426_p0), %s1437_s24, 128, %s1441_s26, %s1444_s8  }
  0x3f   : > { %p1671_p1 = scmp.lt.s32.totalorder %s1303_s19, 9  ;;  %p1672_p2 = scmp.ge.s32.totalorder %s1303_s19, 1 }
  0x40   : > { %s1486_s21 = scalar_lea.hbm %s1644_s0, %s1430_s11  ;;  %s183_s25 = scalar_lea.vmem [#allocation4], %s1420_s7 }
  0x41   : > { %p1478_p6 = pnand %p1672_p2, %p1671_p1  ;;  %s193_s29 = sshll.u32 %s183_s25, 4  ;;  %s1489_s29 = int_to_ptr.vmem [resolvable:$true] %s193_s29 }
  0x42   : > { %s1495_s22 = scalar_lea.hbm %s1646_s2, %s1430_s11  ;;  %s1674_s1 = sand.u32 1, %s1283_s14  }
  0x43   : > { %s1673_s23 = scalar_select %p1478_p6, 1, 0 }
  0x44   : > { %s180_s18 = scalar_lea.sflag [#allocation5], %s1674_s1  ;;  %s1141_s17 = scalar_lea.hbm %s1486_s21, 128 }
  0x45   : > { %p1142_p8 = scmp.ne.s32.totalorder %s1486_s21, %s1141_s17  ;;  %s1146_s6 = scalar_lea.hbm %s1644_s0, 1024 }
  0x46   : > { %p1147_p11 = scmp.lt.u32.totalorder %s1486_s21, %s1644_s0  ;;  %p1148_p13 = scmp.lt.u32.totalorder %s1146_s6, %s1141_s17 }
  0x47   : > { %p1144_p9 = pnand %p1142_p8, %p1450_p4  ;;  %p1150_p5 = scmp.lt.u32.totalorder %s1141_s17, %s1486_s21 }
  0x48   : > { %p1149_p3 = por %p1148_p13, %p1147_p11 }
  0x49   : > { %p1145_p12 = pneg %p1144_p9 }
  0x4a   : > { %p1151_p7 = por %p1150_p5, %p1149_p3 }
  0x4c   : > { %p1152_p10 = pnand %p1151_p7, %p1145_p12 }
  0x4e   : > { %1155 = shalt.err (!%p1152_p10)
}
  0x4f   : > { %s1156_s1 = scalar_lea.vmem %s1489_s29, 128  ;;  %s1306_s11 = smov [#allocation4]  }
  0x50   : > { %p1157_p1 = scmp.ne.s32.totalorder %s1489_s29, %s1156_s1  ;;  %s1161_s24 = sshll.u32 %s1306_s11, 4  ;;  %s1162_s24 = int_to_ptr.vmem [resolvable:$false] %s1161_s24 }
  0x51   : > { %s1163_s4 = scalar_lea.vmem %s1162_s24, 256  ;;  %p1164_p9 = scmp.lt.s32.totalorder %s1489_s29, %s1162_s24 }
  0x52   : > { %p1159_p2 = pnand %p1157_p1, %p1450_p4  ;;  %p1165_p6 = scmp.lt.s32.totalorder %s1163_s4, %s1156_s1 }
  0x54   : > { %p1160_p8 = pneg %p1159_p2  ;;  %p1166_p11 = por %p1165_p6, %p1164_p9 }
  0x56   : > { %p1167_p13 = pnand %p1166_p11, %p1160_p8 }
  0x58   : > { %1170 = shalt.err (!%p1167_p13)
}
  0x59   : > { %1021 = dma.hbm_to_vmem [thread:$0]  (!%p1426_p0), %s1486_s21, 128, %s1489_s29, %s180_s18  }
  0x5a   : > { %s225_s17 = scalar_lea.vmem [#allocation9], %s1420_s7  ;;  %s1171_s26 = scalar_lea.hbm %s1495_s22, 128 }
  0x5b   : > { %s235_s6 = sshll.u32 %s225_s17, 4  ;;  %p1172_p12 = scmp.ne.s32.totalorder %s1495_s22, %s1171_s26  ;;  %s236_s6 = int_to_ptr.vmem [resolvable:$true] %s235_s6 }
  0x5c   : > { %s1176_s25 = scalar_lea.hbm %s1646_s2, 1024  ;;  %p1177_p5 = scmp.lt.u32.totalorder %s1495_s22, %s1646_s2 }
  0x5d   : > { %p1174_p6 = pnand %p1172_p12, %p1450_p4  ;;  %p1178_p7 = scmp.lt.u32.totalorder %s1176_s25, %s1171_s26 }
  0x5e   : > { %p1180_p1 = scmp.lt.u32.totalorder %s1171_s26, %s1495_s22 }
  0x5f   : > { %p1175_p3 = pneg %p1174_p6  ;;  %p1179_p10 = por %p1178_p7, %p1177_p5 }
  0x61   : > { %p1181_p2 = por %p1180_p1, %p1179_p10 }
  0x63   : > { %p1182_p8 = pnand %p1181_p2, %p1175_p3 }
  0x65   : > { %1185 = shalt.err (!%p1182_p8)
}
  0x66   : > { %s1186_s18 = scalar_lea.vmem %s236_s6, 128  ;;  %s1307_s7 = smov [#allocation9]  }
  0x67   : > { %p1187_p9 = scmp.ne.s32.totalorder %s236_s6, %s1186_s18  ;;  %s1191_s21 = sshll.u32 %s1307_s7, 4  ;;  %s1192_s21 = int_to_ptr.vmem [resolvable:$false] %s1191_s21 }
  0x68   : > { %s1193_s29 = scalar_lea.vmem %s1192_s21, 256  ;;  %p1194_p12 = scmp.lt.s32.totalorder %s236_s6, %s1192_s21 }
  0x69   : > { %p1189_p11 = pnand %p1187_p9, %p1450_p4  ;;  %p1195_p6 = scmp.lt.s32.totalorder %s1193_s29, %s1186_s18 }
  0x6b   : > { %p1190_p13 = pneg %p1189_p11  ;;  %p1196_p0 = por %p1195_p6, %p1194_p12 }
  0x6d   : > { %p1197_p5 = pnand %p1196_p0, %p1190_p13 }
  0x6f   : > { %1200 = shalt.err (!%p1197_p5)
}
  0x70   : > { %p1675_p7 = scmp.ne.s32.totalorder %s1668_s10, 0  ;;  %p1676_p3 = scmp.ne.s32.totalorder %s1673_s23, 0 }
  0x71   : > { %s1542_s5 = sand.u32 (!%p1676_p3), 1, %s1279_s13   ;;  %p1677_p0 = scmp.ne.s32.totalorder (!%p1676_p3), %s1663_s27, 0 }
  0x72   : > { %1027 = dma.hbm_to_vmem [thread:$0]  (!%p1675_p7), %s1495_s22, 128, %s236_s6, %s1444_s8  }
  0x73   : > { %244 = sbr.rel (%p1676_p3) target bundleno = 729 (0x2d9), region = 32  ;;  %s1545_s24 = sshll.u32 (!%p1676_p3), %s1542_s5, 3 }
  0x74   : > { %s247_s4 = scalar_lea.sflag (!%p1676_p3), [#allocation5], %s1542_s5  ;;  %s250_s17 = scalar_lea.vmem (!%p1676_p3), [#allocation4], %s1545_s24 }
  0x7a   : > { %1262 = dma.done.wait (%p1677_p0), %s247_s4, 128  }
  0x7b   : > { %1264 = vsyncadd (%p1677_p0), %s247_s4, 4294967168  ;;  %s255_s10 = sand.u32 1, %s1375_s20   ;;  %s259_s23 = scalar_lea.vmem [#allocation7], %s1545_s24 }
  0x7c   : > { %s256_s8 = scalar_lea.sflag [#allocation8], %s255_s10 }
  0x7d   : > { %1266 = dma.done.wait (%p1677_p0), %s256_s8, 256  }
  0x7e   : > { %1268 = vsyncadd (%p1677_p0), %s256_s8, 4294967040  ;;  %vm305_vm0 = vcmask 130048   ;;  %vm308_vm1 = vcmask 122880   ;;  %v1308_v0 = vmov 0.0   ;;  %vm1309_vm2 = vmmov 0   ;;  %v316_v2 = vld [vmem:[%s259_s23] sm:$0xff] }
  0x7f   : > { %978 = vmatprep.subr.mxu0 %v1308_v0  ;;  %309 = vst.msk [vmem:[#allocation3] sm:$0x1] %vm308_vm1, %v1308_v0  ;;  %980 = vmatprep.mubr.msk.f32.mxu0 %vm1309_vm2, %v1308_v0  ;;  %v1310_v1 = vmov 0.0|0.0   ;;  %v310_v3 = vld [vmem:[%s250_s17] sm:$0xff]  ;;  %v319_v4 = vmul.f32 1.442695, %v316_v2  ;;  %v322_v9 = vlaneseq }
  0x80   : > { %306 = vst.msk [vmem:[#allocation2] sm:$0xff] %vm305_vm0, %v1308_v0  ;;  %307 = vst.msk [vmem:[#allocation2 + $0x8] sm:$0xff] %vm305_vm0, %v1308_v0  ;;  %1005 = vmatprep.subr.bf16.mxu1 %v1310_v1  ;;  %987 = vmatprep.mubr.msk.f32.mxu1 %vm1309_vm2, %v1308_v0  ;;  %v313_v5 = vmul.f32 1.442695, %v310_v3  ;;  %v318_v11 = vadd.f32 1.0, %v316_v2  ;;  %vm317_vm3 = vcmp.gt.f32.partialorder %v316_v2, 0.0 }
  0x81   : > { %1105 = vpow2.f32 %v319_v4  ;;  %v323_v10 = vshrl.u32 %v322_v9, 7  ;;  %v312_v12 = vadd.f32 1.0, %v310_v3  ;;  %vm311_vm5 = vcmp.gt.f32.partialorder %v310_v3, 0.0  ;;  %s268_s20 = scalar_lea.vmem [#allocation9], %s1545_s24  ;;  %s962_s27 = sshll.u32 %s1291_s16, 2 }
  0x82   : > { %1107 = vpow2.f32 %v313_v5  ;;  %v1311_v18 = vmov 1.0   ;;  %v331_v28 = vld [vmem:[%s268_s20] sm:$0xff]  ;;  %v410_v32 = vand.u32 127, %v322_v9  ;;  %vm485_vm7 = vcmask 64512   ;;  %s792_s22 = sadd.s32 %s1287_s15, %s962_s27  ;;  %s300_s26 = scalar_lea.vmem [#allocation10], %s1545_s24 }
  0x83   : > { %vm327_vm4 = vcmp.ge.s32.totalorder %v323_v10, 1  ;;  %v1312_v38 = vmov 0   ;;  %s963_s6 = sshll.u32 %s792_s22, 7  ;;  %s796_s9 = sshll.u32 %s300_s26, 4  ;;  %s1591_s9 = int_to_ptr.vmem [resolvable:$true] %s796_s9 }
  0x84   : > { %vm411_vm6 = vcmp.ge.s32.totalorder %v323_v10, %v410_v32  ;;  %1103 = vset.pattern.permute.xlu1 %v1312_v38  ;;  %s1589_s1 = scalar_lea.hbm %s1647_s3, %s963_s6  ;;  %s780_s11 = scalar_lea.sflag [#allocation6], %s1542_s5 }
  0x85   : > { %s1201_s16 = scalar_lea.vmem %s1591_s9, 128  ;;  %p1678_p10 = scmp.ne.s32.totalorder %s1664_s28, 0 }
  0x86   : > { %v768_v26 = vld [vmem:[#allocation3] sm:$0x1]  ;;  %p1202_p4 = scmp.ne.s32.totalorder %s1591_s9, %s1201_s16  ;;  %s1313_s15 = smov [#allocation10]  }
  0x87   : > { %v1564_v6 = vld [vmem:[#allocation2] sm:$0xff]  ;;  %v1566_v7 = vld [vmem:[#allocation2 + $0x8] sm:$0xff]  ;;  %v957_v29 = vld [vmem:[#allocation3] ss:$0 sm:$0xff]  ;;  %s1205_s18 = sshll.u32 %s1313_s15, 4  ;;  %s1206_s18 = int_to_ptr.vmem [resolvable:$false] %s1205_s18 }
  0x88   : > { %v1006_v8 = vpack.c.bf16 %v1566_v7, %v1564_v6  ;;  %p1203_p1 = pnand %p1202_p4, %p1678_p10  ;;  %s1207_s7 = scalar_lea.vmem %s1206_s18, 256 }
  0x89   : > { %p1208_p8 = scmp.lt.s32.totalorder %s1591_s9, %s1206_s18  ;;  %p1209_p9 = scmp.lt.s32.totalorder %s1207_s7, %s1201_s16 }
  0x8a   : > { %1007 = vmatpush3.bf16.msra.mxu1 %v1006_v8  ;;  %p1204_p2 = pneg %p1203_p1 }
  0x8b   : > { %990 = vmatprep.subr.mxu1 %v1308_v0  ;;  %v1106_v13 = vpop.eup %1105  ;;  %p1210_p11 = por %p1209_p9, %p1208_p8 }
  0x8c   : > { %v1108_v14 = vpop.eup %1107  ;;  %v321_v15 = vsel %vm317_vm3, %v318_v11, %v1106_v13 }
  0x8d   : > { %v330_v16 = vsel %vm327_vm4, %v321_v15, 0.0  ;;  %v315_v17 = vsel %vm311_vm5, %v312_v12, %v1108_v14  ;;  %p1211_p13 = pnand %p1210_p11, %p1204_p2 }
  0x8e   : > { %979 = vmatpush3.xpose.msk.msra.mxu0 %vm305_vm0, %v330_v16  ;;  %988 = vmatmul.mubr.msk.f32.vlgmr.msra.gmra.mrb[0].mxu1 %vm305_vm0, %v315_v17  ;;  %v769_v19 = vsel %vm305_vm0, %v330_v16, 0.0  ;;  %v566_v30 = vmul.f32 %v957_v29, %v315_v17 }
  0x8f   : > { %995 = vmatprep.subr.mxu0 %v1308_v0  ;;  %992 = vmatprep.mubr.msk.f32.mxu1 %vm1309_vm2, %v1308_v0  ;;  %v770_v20 = vrot.slane %v769_v19, 4 }
  0x90   : > { %651 = vxpose.xlu0.b32.start.end [1/1] (short) (narrow) %v330_v16, 16  ;;  %991 = vmatpush3.msra.mxu1 %v331_v28  ;;  %v567_v31 = vsel %vm305_vm0, %v566_v30, 0.0 }
  0x91   : > { %981 = vmatmul.mubr.msk.f32.vlgmr.msra.gmra.mrb[0].mxu0 %vm305_vm0, %v315_v17  ;;  %v771_v21 = vadd.f32 %v770_v20, %v769_v19 }
  0x92   : > { %996 = vmatpush3.msra.mxu0 %v1311_v18  ;;  %997 = vmatprep.mubr.msk.f32.mxu0 %vm1309_vm2, %v1308_v0 }
  0x93   : > { %v772_v22 = vrot.slane %v771_v21, 2  ;;  %1000 = vmatprep.subr.mxu0 %v331_v28 }
  0x95   : > { %v773_v23 = vadd.f32 %v772_v22, %v771_v21 }
  0x97   : > { %v774_v24 = vrot.slane %v773_v23, 1 }
  0x99   : > { %v775_v25 = vadd.f32 %v774_v24, %v773_v23 }
  0x9b   : > { %v776_v27 = vadd.f32 %v775_v25, %v768_v26 }
  0x9d   : > { %778 = vst.msk [vmem:[#allocation3] sm:$0x1] %vm308_vm1, %v776_v27 }
  0xb9   : > { %1104 = vset.pattern.permute.xlu0 %v1312_v38 }
  0xc1   : > { %568 = vadd.xlane.f32.xlu0 %v567_v31 }
 0x110   : > { %v667_v33 = vpop.trf.xlu0 }
 0x114   : > { %v668_v37 = vpop.trf.xlu0 }
 0x14e   : > { %v569_v39 = vpop.xlane.xlu0 %568 }
 0x164   : > { %v405_v34 = vpop.f32.mrb[0].mxu0 }
 0x165   : > { %v412_v35 = vsel %vm411_vm6, %v405_v34, 0.0  ;;  %v982_v36 = vpop.f32.mrb[1].mxu0 }
 0x166   : > { %993 = vmatmul.mubr.msk.f32.vlgmr.msra.gmra.mrb[0].mxu1 %vm485_vm7, %v412_v35  ;;  %998 = vmatmul.mubr.msk.f32.vlgmr.msra.gmra.mrb[2].mxu0 %vm485_vm7, %v412_v35 }
 0x167   : > { %1001 = vmatpush3.msra.mxu0 %v331_v28  ;;  %1002 = vmatprep.mubr.msk.f32.mxu0 %vm485_vm7, %v667_v33 }
 0x16a   : > { %1003 = vmatmul.mubr.msk.f32.vlgmr.msra.gmra.mrb[4].mxu0 %vm485_vm7, %v668_v37 }
 0x239   : > { %v636_v40 = vpop.f32.mrb[2].mxu0  ;;  %v555_v41 = vpop.f32.mrb[0].mxu1 }
 0x23a   : > { %v637_v42 = vadd.f32 %v636_v40, %v569_v39  ;;  %v994_v43 = vpop.f32.mrb[1].mxu1  ;;  %v999_v44 = vpop.f32.mrb[3].mxu0 }
 0x23c   : > { %v640_v45 = vadd.f32 1e-05, %v637_v42 }
 0x23d   : > { %v1004_v46 = vpop.f32.mrb[4].mxu0 }
 0x23e   : > { %1109 = vrcp.f32 %v640_v45  ;;  %v765_v47 = vadd.f32 %v1004_v46, %v1566_v7  ;;  %v755_v48 = vpop.f32.mrb[5].mxu0 }
 0x23f   : > { %v764_v49 = vadd.f32 %v755_v48, %v1564_v6 }
 0x240   : > { %767 = vst.msk [vmem:[#allocation2 + $0x8] sm:$0xff] %vm305_vm0, %v765_v47 }
 0x241   : > { %766 = vst.msk [vmem:[#allocation2] sm:$0xff] %vm305_vm0, %v764_v49 }
 0x248   : > { %v1110_v50 = vpop.eup %1109 }
 0x249   : > { %644 = vperm.xlu1 %1103, %v1110_v50  }
 0x2c8   : > { %v645_v51 = vpop.permute.xlu1 %644 }
 0x2c9   : > { %v647_v52 = vmul.f32 %v645_v51, %v555_v41 }
 0x2cb   : > { %648 = vst.msk [vmem:[%s300_s26] sm:$0xff] %vm305_vm0, %v647_v52 }
 0x2cc   : > { %1214 = shalt.err (!%p1211_p13)
}
 0x2cd   : > { %s1215_s21 = scalar_lea.hbm %s1589_s1, 128  ;;  %s1219_s24 = scalar_lea.hbm %s1647_s3, 1024 }
 0x2ce   : > { %p1216_p12 = scmp.ne.s32.totalorder %s1589_s1, %s1215_s21  ;;  %p1220_p7 = scmp.lt.u32.totalorder %s1589_s1, %s1647_s3 }
 0x2cf   : > { %p1221_p3 = scmp.lt.u32.totalorder %s1219_s24, %s1215_s21  ;;  %p1223_p4 = scmp.lt.u32.totalorder %s1215_s21, %s1589_s1 }
 0x2d0   : > { %p1217_p6 = pnand %p1216_p12, %p1678_p10 }
 0x2d1   : > { %p1222_p0 = por %p1221_p3, %p1220_p7 }
 0x2d2   : > { %p1218_p5 = pneg %p1217_p6 }
 0x2d3   : > { %p1224_p1 = por %p1223_p4, %p1222_p0 }
 0x2d5   : > { %p1225_p2 = pnand %p1224_p1, %p1218_p5 }
 0x2d7   : > { %1228 = shalt.err (!%p1225_p2)
}
 0x2d8   : > { %1016 = dma.vmem_to_hbm [thread:$0]  (%p1678_p10), %s1591_s9, 128, %s1589_s1, %s780_s11  }
 0x2d9 PF: > { %s1679_s10 = sld [smem:[#allocation18_spill]]  ;;  %p1033_p8 = scmp.ge.s32.totalorder %s1303_s19, 2 }
 0x2da   : > { %s808_s8 = sand.u32 1, %s1275_s12  }
 0x2db   : > { %s809_s23 = scalar_lea.sflag [#allocation6], %s808_s8 }
 0x2df   : > { %p1680_p9 = scmp.ne.s32.totalorder %s1679_s10, 0 }
 0x2e1   : > { %p1029_p11 = pnand %p1033_p8, %p1680_p9 }
 0x2e3   : > { %1270 = dma.done.wait (!%p1029_p11), %s809_s23, 128  }
 0x2e4   : > { %1272 = vsyncadd (!%p1029_p11), %s809_s23, 4294967168  ;;  %s22_s19 = sadd.s32 1, %s1303_s19   ;;  %s1681_s28 = sld [smem:[#allocation19_spill]] }
 0x2e5   : > { %p19_p13 = scmp.ge.s32.totalorder %s22_s19, 10   ;;  %s1682_s15 = sld [smem:[#allocation14_spill]] }
 0x2e6   : > { %s1683_s16 = sld [smem:[#allocation15_spill]]  ;;  %s1684_s17 = sld [smem:[#allocation16_spill]] }
 0x2e7   : > { %s1685_s18 = sld [smem:[#allocation17_spill]]  ;;  %s1686_s12 = smov %s1279_s13 }
 0x2e8   : > { %s1687_s13 = smov %s1283_s14  ;;  %21 = sbr.rel (!%p19_p13) target bundleno = 11 (0xb), region = 105 }
 0x2ea   : > { %s1688_s14 = smov %s1681_s28 }
 0x2ef   :  { %814 = vsyncpa [#allocation5], 1 }
 0x2f0   :  { %816 = vsyncpa [#allocation5 + $0x1], 1 }
 0x2f1   :  { %817 = vsyncpa [#allocation8], 1 }
 0x2f2   :  { %819 = vsyncpa [#allocation8 + $0x1], 1 }
 0x2f3   :  { %820 = vsyncpa [#allocation6], 1 }
 0x2f4   :  { %822 = vsyncpa [#allocation6 + $0x1], 1 }

</bundles_post_ra>
